<compile_context>
chip_gen: v5e
topology: v5e:2x2
jax: 0.10.0
libtpu: 0.0.40
codegen_flags: <defaults>
</compile_context>

<pallas_src>
import functools

import jax
import jax.numpy as jnp
from jax.experimental import pallas as pl
from jax.experimental.pallas import tpu as pltpu


def _round_up(x, m):
    return (x + m - 1) // m * m


def _skipgram_kernel(t_ref, cn_ref, s_ref):
    # t_ref:  (tb, D)        target embeddings
    # cn_ref: (K+1, tb, D)   slab 0 = context, slabs 1..K = negatives
    # s_ref:  (tb, K+1)      col 0 = pos_score, cols 1..K = neg_score
    k1 = cn_ref.shape[0]
    cols = []
    for j in range(k1):                                 # small K+1, statically unrolled
        # Re-read t per slab instead of hoisting: keeps live vregs bounded at
        # large tiles; extra loads ride otherwise-idle vld slots (DMA-bound).
        t = t_ref[...].astype(jnp.float32)              # (tb, D)
        e = cn_ref[j].astype(jnp.float32)               # (tb, D) leading-axis slab
        d = jnp.sum(e * t, axis=-1, keepdims=True)      # VPU mul + XLU lane reduce
        cols.append(d if j == 0 else -d)                # neg_score already negated
    s_ref[...] = jnp.concatenate(cols, axis=-1)         # one coalesced (tb, K+1) store


def _vmem_capacity_bytes():
    try:
        return int(pltpu.get_tpu_info().vmem_capacity_bytes)
    except Exception:
        # Conservative fallback (v7x per-TensorCore VMEM); only affects tile
        # sizing, never correctness.
        return 64 * 1024 * 1024


def _choose_tiling(B, D, K1, elem_bytes, tile_b=None):
    cap = _vmem_capacity_bytes()
    budget = min(cap // 2, 48 * 1024 * 1024)
    # Double-buffered bytes per batch row: target + [ctx;neg] inputs + score out.
    per_row = 2 * elem_bytes * (K1 + 1) * D + 2 * 4 * K1
    if tile_b is not None:
        tb = max(8, _round_up(int(tile_b), 8))
    else:
        tb = budget // max(per_row, 1)
        tb = max(256, min(2048, tb)) // 8 * 8            # target ~2-8 MB slabs
    tb = max(8, min(tb, _round_up(B, 8)))
    work = 2 * (tb * (K1 + 1) * D * elem_bytes + tb * K1 * 4)
    vmem_limit = int(min(max(cap - (8 << 20), work + (4 << 20)),
                         max(2 * work + (8 << 20), 32 << 20)))
    return tb, vmem_limit


@functools.partial(jax.jit, static_argnames=("tile_b", "use_bf16"))
def skip_gram_neg_sampling(target_table, context_table, target, context,
                           negatives, *, tile_b=None, use_bf16=False):
    B = target.shape[0]
    K = negatives.shape[1]
    D = target_table.shape[1]
    K1 = K + 1

    emb_dtype = jnp.bfloat16 if use_bf16 else jnp.float32
    elem_bytes = 2 if use_bf16 else 4
    tb, vmem_limit = _choose_tiling(B, D, K1, elem_bytes, tile_b)
    Bp = _round_up(B, tb)
    pad = Bp - B

    # Pad the tiny index arrays (index 0 is valid; padded rows sliced off
    # below) so the gathers directly produce the padded, kernel-friendly
    # layout with no extra HBM round trip through jnp.pad of big tensors.
    target_p = jnp.pad(target.astype(jnp.int32), (0, pad))
    idx = jnp.concatenate([context[:, None], negatives], axis=1).astype(jnp.int32)
    idx_p = jnp.pad(idx, ((0, pad), (0, 0)))             # (Bp, K+1)

    # Embedding lookups (XLA gathers). Note: jnp.take clamps OOB indices where
    # PyTorch nn.Embedding would raise.
    t_emb = jnp.take(target_table, target_p, axis=0).astype(emb_dtype)     # (Bp, D)
    cn_emb = jnp.take(context_table, idx_p.T, axis=0).astype(emb_dtype)    # (K+1, Bp, D)

    scores = pl.pallas_call(
        _skipgram_kernel,
        out_shape=jax.ShapeDtypeStruct((Bp, K1), jnp.float32),
        grid=(Bp // tb,),
        in_specs=[
            pl.BlockSpec((tb, D), lambda i: (i, 0)),
            pl.BlockSpec((K1, tb, D), lambda i: (0, i, 0)),
        ],
        out_specs=pl.BlockSpec((tb, K1), lambda i: (i, 0)),
        compiler_params=pltpu.CompilerParams(
            dimension_semantics=("parallel",),
            vmem_limit_bytes=vmem_limit,
        ),
    )(t_emb, cn_emb)

    pos_score = scores[:B, 0]      # (B,)
    neg_score = scores[:B, 1:]     # (B, K)
    return pos_score, neg_score


if __name__ == "__main__":
    # Small, deterministic setup consistent with the module's forward.
    vocab_size = 64
    embedding_dim = 128
    batch = 20
    num_negatives = 8

    key = jax.random.PRNGKey(0)
    k_t, k_c, k_tgt, k_ctx, k_neg = jax.random.split(key, 5)

    # nn.Embedding default init ~ N(0, 1)
    target_table = jax.random.normal(k_t, (vocab_size, embedding_dim), dtype=jnp.float32)
    context_table = jax.random.normal(k_c, (vocab_size, embedding_dim), dtype=jnp.float32)

    target = jax.random.randint(k_tgt, (batch,), 0, vocab_size, dtype=jnp.int32)
    context = jax.random.randint(k_ctx, (batch,), 0, vocab_size, dtype=jnp.int32)
    negatives = jax.random.randint(k_neg, (batch, num_negatives), 0, vocab_size,
                                   dtype=jnp.int32)

    # Pure-JAX reference of the PyTorch forward.
    t_emb = target_table[target]
    c_emb = context_table[context]
    n_emb = context_table[negatives]
    ref_pos = jnp.sum(t_emb * c_emb, axis=1)
    ref_neg = -jnp.sum(n_emb * t_emb[:, None, :], axis=-1)

    # Default (auto-sized) tile: single grid step at this batch size.
    pos_score, neg_score = skip_gram_neg_sampling(
        target_table, context_table, target, context, negatives)
    pos_score = jax.block_until_ready(pos_score)
    neg_score = jax.block_until_ready(neg_score)
    assert pos_score.shape == (batch,)
    assert neg_score.shape == (batch, num_negatives)
    assert jnp.allclose(pos_score, ref_pos, atol=1e-4, rtol=1e-4)
    assert jnp.allclose(neg_score, ref_neg, atol=1e-4, rtol=1e-4)

    # Small explicit tile to exercise the multi-step grid + batch-padding path.
    pos2, neg2 = skip_gram_neg_sampling(
        target_table, context_table, target, context, negatives, tile_b=8)
    pos2 = jax.block_until_ready(pos2)
    neg2 = jax.block_until_ready(neg2)
    assert jnp.allclose(pos2, ref_pos, atol=1e-4, rtol=1e-4)
    assert jnp.allclose(neg2, ref_neg, atol=1e-4, rtol=1e-4)

    print("KERNEL_OK")
</pallas_src>

<mosaic_0001>
module attributes {stable_mosaic.version = 11 : i64} {
  func.func @_skipgram_kernel(%arg0: i32, %arg1: memref<24x128xf32, #tpu.memory_space<vmem>>, %arg2: memref<9x24x128xf32, #tpu.memory_space<vmem>>, %arg3: memref<24x9xf32, #tpu.memory_space<vmem>>) attributes {dimension_semantics = [#tpu.dimension_semantics<parallel>], iteration_bounds = array<i64: 1>, scalar_prefetch = 0 : i64, scratch_operands = 0 : i64, tpu.core_type = #tpu.core_type<tc>, window_params = [{transform_indices = @transform_0, window_bounds = array<i64: 24, 128>}, {transform_indices = @transform_1, window_bounds = array<i64: 9, 24, 128>}, {transform_indices = @transform_2, window_bounds = array<i64: 24, 9>}]} {
    %c0 = arith.constant 0 : index
    %c0_0 = arith.constant 0 : index
    %0 = vector.load %arg1[%c0, %c0_0] : memref<24x128xf32, #tpu.memory_space<vmem>>, vector<24x128xf32>
    %c0_1 = arith.constant 0 : index
    %c0_2 = arith.constant 0 : index
    %c0_3 = arith.constant 0 : index
    %1 = vector.load %arg2[%c0_1, %c0_2, %c0_3] : memref<9x24x128xf32, #tpu.memory_space<vmem>>, vector<1x24x128xf32>
    %2 = vector.shape_cast %1 : vector<1x24x128xf32> to vector<24x128xf32>
    %3 = arith.mulf %2, %0 : vector<24x128xf32>
    %cst = arith.constant dense<0.000000e+00> : vector<24xf32>
    %4 = vector.multi_reduction <add>, %3, %cst [1] : vector<24x128xf32> to vector<24xf32>
    %5 = vector.shape_cast %4 : vector<24xf32> to vector<24x1xf32>
    %c0_4 = arith.constant 0 : index
    %c0_5 = arith.constant 0 : index
    %6 = vector.load %arg1[%c0_4, %c0_5] : memref<24x128xf32, #tpu.memory_space<vmem>>, vector<24x128xf32>
    %c1 = arith.constant 1 : index
    %c0_6 = arith.constant 0 : index
    %c0_7 = arith.constant 0 : index
    %7 = vector.load %arg2[%c1, %c0_6, %c0_7] : memref<9x24x128xf32, #tpu.memory_space<vmem>>, vector<1x24x128xf32>
    %8 = vector.shape_cast %7 : vector<1x24x128xf32> to vector<24x128xf32>
    %9 = arith.mulf %8, %6 : vector<24x128xf32>
    %cst_8 = arith.constant dense<0.000000e+00> : vector<24xf32>
    %10 = vector.multi_reduction <add>, %9, %cst_8 [1] : vector<24x128xf32> to vector<24xf32>
    %11 = vector.shape_cast %10 : vector<24xf32> to vector<24x1xf32>
    %cst_9 = arith.constant 0.000000e+00 : f32
    %12 = vector.broadcast %cst_9 : f32 to vector<24x1xf32>
    %13 = arith.subf %12, %11 : vector<24x1xf32>
    %c0_10 = arith.constant 0 : index
    %c0_11 = arith.constant 0 : index
    %14 = vector.load %arg1[%c0_10, %c0_11] : memref<24x128xf32, #tpu.memory_space<vmem>>, vector<24x128xf32>
    %c2 = arith.constant 2 : index
    %c0_12 = arith.constant 0 : index
    %c0_13 = arith.constant 0 : index
    %15 = vector.load %arg2[%c2, %c0_12, %c0_13] : memref<9x24x128xf32, #tpu.memory_space<vmem>>, vector<1x24x128xf32>
    %16 = vector.shape_cast %15 : vector<1x24x128xf32> to vector<24x128xf32>
    %17 = arith.mulf %16, %14 : vector<24x128xf32>
    %cst_14 = arith.constant dense<0.000000e+00> : vector<24xf32>
    %18 = vector.multi_reduction <add>, %17, %cst_14 [1] : vector<24x128xf32> to vector<24xf32>
    %19 = vector.shape_cast %18 : vector<24xf32> to vector<24x1xf32>
    %cst_15 = arith.constant 0.000000e+00 : f32
    %20 = vector.broadcast %cst_15 : f32 to vector<24x1xf32>
    %21 = arith.subf %20, %19 : vector<24x1xf32>
    %c0_16 = arith.constant 0 : index
    %c0_17 = arith.constant 0 : index
    %22 = vector.load %arg1[%c0_16, %c0_17] : memref<24x128xf32, #tpu.memory_space<vmem>>, vector<24x128xf32>
    %c3 = arith.constant 3 : index
    %c0_18 = arith.constant 0 : index
    %c0_19 = arith.constant 0 : index
    %23 = vector.load %arg2[%c3, %c0_18, %c0_19] : memref<9x24x128xf32, #tpu.memory_space<vmem>>, vector<1x24x128xf32>
    %24 = vector.shape_cast %23 : vector<1x24x128xf32> to vector<24x128xf32>
    %25 = arith.mulf %24, %22 : vector<24x128xf32>
    %cst_20 = arith.constant dense<0.000000e+00> : vector<24xf32>
    %26 = vector.multi_reduction <add>, %25, %cst_20 [1] : vector<24x128xf32> to vector<24xf32>
    %27 = vector.shape_cast %26 : vector<24xf32> to vector<24x1xf32>
    %cst_21 = arith.constant 0.000000e+00 : f32
    %28 = vector.broadcast %cst_21 : f32 to vector<24x1xf32>
    %29 = arith.subf %28, %27 : vector<24x1xf32>
    %c0_22 = arith.constant 0 : index
    %c0_23 = arith.constant 0 : index
    %30 = vector.load %arg1[%c0_22, %c0_23] : memref<24x128xf32, #tpu.memory_space<vmem>>, vector<24x128xf32>
    %c4 = arith.constant 4 : index
    %c0_24 = arith.constant 0 : index
    %c0_25 = arith.constant 0 : index
    %31 = vector.load %arg2[%c4, %c0_24, %c0_25] : memref<9x24x128xf32, #tpu.memory_space<vmem>>, vector<1x24x128xf32>
    %32 = vector.shape_cast %31 : vector<1x24x128xf32> to vector<24x128xf32>
    %33 = arith.mulf %32, %30 : vector<24x128xf32>
    %cst_26 = arith.constant dense<0.000000e+00> : vector<24xf32>
    %34 = vector.multi_reduction <add>, %33, %cst_26 [1] : vector<24x128xf32> to vector<24xf32>
    %35 = vector.shape_cast %34 : vector<24xf32> to vector<24x1xf32>
    %cst_27 = arith.constant 0.000000e+00 : f32
    %36 = vector.broadcast %cst_27 : f32 to vector<24x1xf32>
    %37 = arith.subf %36, %35 : vector<24x1xf32>
    %c0_28 = arith.constant 0 : index
    %c0_29 = arith.constant 0 : index
    %38 = vector.load %arg1[%c0_28, %c0_29] : memref<24x128xf32, #tpu.memory_space<vmem>>, vector<24x128xf32>
    %c5 = arith.constant 5 : index
    %c0_30 = arith.constant 0 : index
    %c0_31 = arith.constant 0 : index
    %39 = vector.load %arg2[%c5, %c0_30, %c0_31] : memref<9x24x128xf32, #tpu.memory_space<vmem>>, vector<1x24x128xf32>
    %40 = vector.shape_cast %39 : vector<1x24x128xf32> to vector<24x128xf32>
    %41 = arith.mulf %40, %38 : vector<24x128xf32>
    %cst_32 = arith.constant dense<0.000000e+00> : vector<24xf32>
    %42 = vector.multi_reduction <add>, %41, %cst_32 [1] : vector<24x128xf32> to vector<24xf32>
    %43 = vector.shape_cast %42 : vector<24xf32> to vector<24x1xf32>
    %cst_33 = arith.constant 0.000000e+00 : f32
    %44 = vector.broadcast %cst_33 : f32 to vector<24x1xf32>
    %45 = arith.subf %44, %43 : vector<24x1xf32>
    %c0_34 = arith.constant 0 : index
    %c0_35 = arith.constant 0 : index
    %46 = vector.load %arg1[%c0_34, %c0_35] : memref<24x128xf32, #tpu.memory_space<vmem>>, vector<24x128xf32>
    %c6 = arith.constant 6 : index
    %c0_36 = arith.constant 0 : index
    %c0_37 = arith.constant 0 : index
    %47 = vector.load %arg2[%c6, %c0_36, %c0_37] : memref<9x24x128xf32, #tpu.memory_space<vmem>>, vector<1x24x128xf32>
    %48 = vector.shape_cast %47 : vector<1x24x128xf32> to vector<24x128xf32>
    %49 = arith.mulf %48, %46 : vector<24x128xf32>
    %cst_38 = arith.constant dense<0.000000e+00> : vector<24xf32>
    %50 = vector.multi_reduction <add>, %49, %cst_38 [1] : vector<24x128xf32> to vector<24xf32>
    %51 = vector.shape_cast %50 : vector<24xf32> to vector<24x1xf32>
    %cst_39 = arith.constant 0.000000e+00 : f32
    %52 = vector.broadcast %cst_39 : f32 to vector<24x1xf32>
    %53 = arith.subf %52, %51 : vector<24x1xf32>
    %c0_40 = arith.constant 0 : index
    %c0_41 = arith.constant 0 : index
    %54 = vector.load %arg1[%c0_40, %c0_41] : memref<24x128xf32, #tpu.memory_space<vmem>>, vector<24x128xf32>
    %c7 = arith.constant 7 : index
    %c0_42 = arith.constant 0 : index
    %c0_43 = arith.constant 0 : index
    %55 = vector.load %arg2[%c7, %c0_42, %c0_43] : memref<9x24x128xf32, #tpu.memory_space<vmem>>, vector<1x24x128xf32>
    %56 = vector.shape_cast %55 : vector<1x24x128xf32> to vector<24x128xf32>
    %57 = arith.mulf %56, %54 : vector<24x128xf32>
    %cst_44 = arith.constant dense<0.000000e+00> : vector<24xf32>
    %58 = vector.multi_reduction <add>, %57, %cst_44 [1] : vector<24x128xf32> to vector<24xf32>
    %59 = vector.shape_cast %58 : vector<24xf32> to vector<24x1xf32>
    %cst_45 = arith.constant 0.000000e+00 : f32
    %60 = vector.broadcast %cst_45 : f32 to vector<24x1xf32>
    %61 = arith.subf %60, %59 : vector<24x1xf32>
    %c0_46 = arith.constant 0 : index
    %c0_47 = arith.constant 0 : index
    %62 = vector.load %arg1[%c0_46, %c0_47] : memref<24x128xf32, #tpu.memory_space<vmem>>, vector<24x128xf32>
    %c8 = arith.constant 8 : index
    %c0_48 = arith.constant 0 : index
    %c0_49 = arith.constant 0 : index
    %63 = vector.load %arg2[%c8, %c0_48, %c0_49] : memref<9x24x128xf32, #tpu.memory_space<vmem>>, vector<1x24x128xf32>
    %64 = vector.shape_cast %63 : vector<1x24x128xf32> to vector<24x128xf32>
    %65 = arith.mulf %64, %62 : vector<24x128xf32>
    %cst_50 = arith.constant dense<0.000000e+00> : vector<24xf32>
    %66 = vector.multi_reduction <add>, %65, %cst_50 [1] : vector<24x128xf32> to vector<24xf32>
    %67 = vector.shape_cast %66 : vector<24xf32> to vector<24x1xf32>
    %cst_51 = arith.constant 0.000000e+00 : f32
    %68 = vector.broadcast %cst_51 : f32 to vector<24x1xf32>
    %69 = arith.subf %68, %67 : vector<24x1xf32>
    %70 = tpu.concatenate %5, %13, %21, %29, %37, %45, %53, %61, %69 in 1 : vector<24x1xf32>, vector<24x1xf32>, vector<24x1xf32>, vector<24x1xf32>, vector<24x1xf32>, vector<24x1xf32>, vector<24x1xf32>, vector<24x1xf32>, vector<24x1xf32> -> vector<24x9xf32>
    %c0_52 = arith.constant 0 : index
    %c0_53 = arith.constant 0 : index
    %71 = vector.load %arg3[%c0_52, %c0_53] : memref<24x9xf32, #tpu.memory_space<vmem>>, vector<24x9xf32>
    tpu.vector_store %arg3[%c0_52, %c0_53], %70 {strides = array<i32>} : memref<24x9xf32, #tpu.memory_space<vmem>>, vector<24x9xf32>,
    return
  }
  func.func @transform_0(%arg0: i32) -> (i32, i32) {
    %c0_i32 = arith.constant 0 : i32
    %c0_i32_0 = arith.constant 0 : i32
    return %arg0, %c0_i32 : i32, i32
  }
  func.func @transform_1(%arg0: i32) -> (i32, i32, i32) {
    %c0_i32 = arith.constant 0 : i32
    %c0_i32_0 = arith.constant 0 : i32
    %c0_i32_1 = arith.constant 0 : i32
    return %c0_i32, %arg0, %c0_i32_0 : i32, i32, i32
  }
  func.func @transform_2(%arg0: i32) -> (i32, i32) {
    %c0_i32 = arith.constant 0 : i32
    %c0_i32_0 = arith.constant 0 : i32
    return %arg0, %c0_i32 : i32, i32
  }
}

</mosaic_0001>

<bundles_post_ra>
// kernel: skip_gram_neg_sampling.1
= control target key start
LH: loop header
LB: loop body
LE: loop exit
PB: predicated region body
PF: predicated region fallthrough
CT: control target
= control target key end

     0   :  { %vm154_vm0 = vcmask 7168   ;;  %vm158_vm1 = vcmask 15360   ;;  %vm162_vm2 = vcmask 23552   ;;  %vm166_vm3 = vcmask 31744   ;;  %s389_s0 = inlined_call_operand.vmem [shape: f32[24,128], index: 0, kind: input, shape index: {}]   ;;  %s390_s1 = inlined_call_operand.vmem [shape: f32[9,24,128], index: 1, kind: input, shape index: {}]   ;;  %s391_s2 = inlined_call_operand.vmem [shape: f32[24,9], index: 2, kind: output, shape index: {}]  }
   0x1   :  { %v236_v0 = vld [vmem:[%s389_s0 + $0x10] sm:$0xff]  ;;  %v244_v2 = vld [vmem:[%s389_s0 + $0x8] sm:$0xff]  ;;  %v195_v4 = vld [vmem:[%s390_s1 + $0x20] sm:$0xff]  ;;  %vm170_vm4 = vcmask 39936   ;;  %vm174_vm5 = vcmask 48128   ;;  %vm178_vm6 = vcmask 56320  }
   0x2   :  { %v16_v1 = vld [vmem:[%s390_s1 + $0x10] sm:$0xff]  ;;  %v253_v5 = vld [vmem:[%s389_s0] sm:$0xff]  ;;  %v31_v7 = vmul.f32 %v195_v4, %v244_v2  ;;  %v194_v9 = vld [vmem:[%s390_s1 + $0x18] sm:$0xff]  ;;  %vm182_vm7 = vcmask 64512   ;;  %vm186_vm8 = vcmask 72704  }
   0x3   :  { %v19_v3 = vmul.f32 %v16_v1, %v236_v0  ;;  %v14_v6 = vld [vmem:[%s390_s1] sm:$0xff]  ;;  %v196_v10 = vld [vmem:[%s390_s1 + $0x28] sm:$0xff]  ;;  %v30_v12 = vmul.f32 %v194_v9, %v253_v5  ;;  %v198_v15 = vld [vmem:[%s390_s1 + $0x38] sm:$0xff] }
   0x4   :  { %v17_v8 = vmul.f32 %v14_v6, %v253_v5  ;;  %35 = vadd.xlane.f32.xlu2 %v31_v7  ;;  %v15_v11 = vld [vmem:[%s390_s1 + $0x8] sm:$0xff]  ;;  %v32_v13 = vmul.f32 %v196_v10, %v236_v0  ;;  %v199_v16 = vld [vmem:[%s390_s1 + $0x40] sm:$0xff]  ;;  %v197_v17 = vld [vmem:[%s390_s1 + $0x30] sm:$0xff]  ;;  %v47_v18 = vmul.f32 %v198_v15, %v244_v2 }
   0x5   :  { %24 = vadd.xlane.f32.xlu1 %v19_v3  ;;  %v18_v14 = vmul.f32 %v15_v11, %v244_v2  ;;  %v48_v19 = vmul.f32 %v199_v16, %v236_v0  ;;  %v46_v20 = vmul.f32 %v197_v17, %v253_v5  ;;  %v201_v21 = vld [vmem:[%s390_s1 + $0x50] sm:$0xff]  ;;  %v202_v22 = vld [vmem:[%s390_s1 + $0x58] sm:$0xff]  ;;  %v200_v23 = vld [vmem:[%s390_s1 + $0x48] sm:$0xff] }
   0x6   :  { %20 = vadd.xlane.f32.xlu0 %v17_v8  ;;  %v63_v24 = vmul.f32 %v201_v21, %v244_v2  ;;  %v64_v25 = vmul.f32 %v202_v22, %v236_v0  ;;  %v62_v26 = vmul.f32 %v200_v23, %v253_v5  ;;  %v204_v27 = vld [vmem:[%s390_s1 + $0x68] sm:$0xff]  ;;  %v217_v28 = vld [vmem:[%s390_s1 + $0xd0] sm:$0xff]  ;;  %v203_v30 = vld [vmem:[%s390_s1 + $0x60] sm:$0xff] }
   0x7   :  { %v205_v29 = vld [vmem:[%s390_s1 + $0x70] sm:$0xff]  ;;  %v144_v31 = vmul.f32 %v217_v28, %v236_v0  ;;  %v79_v32 = vmul.f32 %v204_v27, %v244_v2  ;;  %v78_v34 = vmul.f32 %v203_v30, %v253_v5  ;;  %v215_v35 = vld [vmem:[%s390_s1 + $0xc0] sm:$0xff]  ;;  %v208_v38 = vld [vmem:[%s390_s1 + $0x88] sm:$0xff] }
   0x8   :  { %v80_v33 = vmul.f32 %v205_v29, %v236_v0  ;;  %v142_v36 = vmul.f32 %v215_v35, %v253_v5  ;;  %v207_v37 = vld [vmem:[%s390_s1 + $0x80] sm:$0xff]  ;;  %v206_v39 = vld [vmem:[%s390_s1 + $0x78] sm:$0xff]  ;;  %v96_v41 = vmul.f32 %v208_v38, %v236_v0  ;;  %v209_v45 = vld [vmem:[%s390_s1 + $0x90] sm:$0xff] }
   0x9   :  { %v95_v40 = vmul.f32 %v207_v37, %v244_v2  ;;  %v94_v42 = vmul.f32 %v206_v39, %v253_v5  ;;  %v210_v43 = vld [vmem:[%s390_s1 + $0x98] sm:$0xff]  ;;  %v211_v44 = vld [vmem:[%s390_s1 + $0xa0] sm:$0xff]  ;;  %v110_v48 = vmul.f32 %v209_v45, %v253_v5  ;;  %v213_v49 = vld [vmem:[%s390_s1 + $0xb0] sm:$0xff] }
   0xa   :  { %v111_v46 = vmul.f32 %v210_v43, %v244_v2  ;;  %v112_v47 = vmul.f32 %v211_v44, %v236_v0  ;;  %v214_v50 = vld [vmem:[%s390_s1 + $0xb8] sm:$0xff]  ;;  %v212_v51 = vld [vmem:[%s390_s1 + $0xa8] sm:$0xff]  ;;  %v127_v52 = vmul.f32 %v213_v49, %v244_v2 }
   0xb   :  { %v128_v53 = vmul.f32 %v214_v50, %v236_v0  ;;  %v126_v54 = vmul.f32 %v212_v51, %v253_v5  ;;  %v216_v55 = vld [vmem:[%s390_s1 + $0xc8] sm:$0xff] }
   0xc   :  { %37 = vadd.xlane.f32.xlu2 %v32_v13  ;;  %v143_v56 = vmul.f32 %v216_v55, %v244_v2 }
   0xd   :  { %33 = vadd.xlane.f32.xlu1 %v30_v12 }
   0xe   :  { %22 = vadd.xlane.f32.xlu0 %v18_v14 }
  0x14   :  { %53 = vadd.xlane.f32.xlu2 %v48_v19 }
  0x15   :  { %51 = vadd.xlane.f32.xlu1 %v47_v18 }
  0x16   :  { %49 = vadd.xlane.f32.xlu0 %v46_v20 }
  0x1c   :  { %69 = vadd.xlane.f32.xlu2 %v64_v25 }
  0x1d   :  { %67 = vadd.xlane.f32.xlu1 %v63_v24 }
  0x1e   :  { %65 = vadd.xlane.f32.xlu0 %v62_v26 }
  0x24   :  { %85 = vadd.xlane.f32.xlu2 %v80_v33 }
  0x25   :  { %83 = vadd.xlane.f32.xlu1 %v79_v32 }
  0x26   :  { %81 = vadd.xlane.f32.xlu0 %v78_v34 }
  0x2c   :  { %101 = vadd.xlane.f32.xlu2 %v96_v41 }
  0x2d   :  { %99 = vadd.xlane.f32.xlu1 %v95_v40 }
  0x2e   :  { %97 = vadd.xlane.f32.xlu0 %v94_v42 }
  0x34   :  { %117 = vadd.xlane.f32.xlu2 %v112_v47 }
  0x35   :  { %115 = vadd.xlane.f32.xlu1 %v111_v46 }
  0x36   :  { %113 = vadd.xlane.f32.xlu0 %v110_v48 }
  0x3c   :  { %133 = vadd.xlane.f32.xlu2 %v128_v53 }
  0x3d   :  { %131 = vadd.xlane.f32.xlu1 %v127_v52 }
  0x3e   :  { %129 = vadd.xlane.f32.xlu0 %v126_v54 }
  0x44   :  { %149 = vadd.xlane.f32.xlu2 %v144_v31 }
  0x45   :  { %147 = vadd.xlane.f32.xlu1 %v143_v56 }
  0x46   :  { %145 = vadd.xlane.f32.xlu0 %v142_v36 }
  0x77   :  { %v36_v58 = vpop.xlane.xlu2 %35 }
  0x78   :  { %v25_v57 = vpop.xlane.xlu1 %24  ;;  %v40_v18 = vsub.f32 0.0, %v36_v58 }
  0x79   :  { %v21_v59 = vpop.xlane.xlu0 %20 }
  0x7f   :  { %v38_v61 = vpop.xlane.xlu2 %37 }
  0x80   :  { %v34_v60 = vpop.xlane.xlu1 %33  ;;  %v41_v14 = vsub.f32 0.0, %v38_v61 }
  0x81   :  { %v23_v62 = vpop.xlane.xlu0 %22  ;;  %v39_v15 = vsub.f32 0.0, %v34_v60 }
  0x82   :  { %v157_v23 = vsel %vm154_vm0, %v25_v57, %v41_v14  ;;  %v156_v24 = vsel %vm154_vm0, %v23_v62, %v40_v18 }
  0x83   :  { %v155_v22 = vsel %vm154_vm0, %v21_v59, %v39_v15 }
  0x87   :  { %v54_v0 = vpop.xlane.xlu2 %53 }
  0x88   :  { %v52_v63 = vpop.xlane.xlu1 %51  ;;  %v57_v16 = vsub.f32 0.0, %v54_v0 }
  0x89   :  { %v50_v1 = vpop.xlane.xlu0 %49  ;;  %v56_v17 = vsub.f32 0.0, %v52_v63 }
  0x8a   :  { %v55_v19 = vsub.f32 0.0, %v50_v1  ;;  %v161_v28 = vsel %vm158_vm1, %v157_v23, %v57_v16 }
  0x8b   :  { %v160_v29 = vsel %vm158_vm1, %v156_v24, %v56_v17 }
  0x8c   :  { %v159_v31 = vsel %vm158_vm1, %v155_v22, %v55_v19 }
  0x8f   :  { %v70_v4 = vpop.xlane.xlu2 %69 }
  0x90   :  { %v68_v3 = vpop.xlane.xlu1 %67  ;;  %v73_v25 = vsub.f32 0.0, %v70_v4 }
  0x91   :  { %v66_v5 = vpop.xlane.xlu0 %65  ;;  %v72_v20 = vsub.f32 0.0, %v68_v3 }
  0x92   :  { %v71_v30 = vsub.f32 0.0, %v66_v5  ;;  %v165_v38 = vsel %vm162_vm2, %v161_v28, %v73_v25 }
  0x93   :  { %v164_v34 = vsel %vm162_vm2, %v160_v29, %v72_v20 }
  0x94   :  { %v163_v42 = vsel %vm162_vm2, %v159_v31, %v71_v30 }
  0x97   :  { %v86_v7 = vpop.xlane.xlu2 %85 }
  0x98   :  { %v84_v6 = vpop.xlane.xlu1 %83  ;;  %v89_v32 = vsub.f32 0.0, %v86_v7 }
  0x99   :  { %v82_v8 = vpop.xlane.xlu0 %81  ;;  %v88_v33 = vsub.f32 0.0, %v84_v6 }
  0x9a   :  { %v87_v35 = vsub.f32 0.0, %v82_v8  ;;  %v169_v45 = vsel %vm166_vm3, %v165_v38, %v89_v32 }
  0x9b   :  { %v168_v46 = vsel %vm166_vm3, %v164_v34, %v88_v33 }
  0x9c   :  { %v167_v49 = vsel %vm166_vm3, %v163_v42, %v87_v35 }
  0x9f   :  { %v102_v2 = vpop.xlane.xlu2 %101 }
  0xa0   :  { %v100_v9 = vpop.xlane.xlu1 %99  ;;  %v105_v36 = vsub.f32 0.0, %v102_v2 }
  0xa1   :  { %v98_v10 = vpop.xlane.xlu0 %97  ;;  %v104_v37 = vsub.f32 0.0, %v100_v9 }
  0xa2   :  { %v103_v39 = vsub.f32 0.0, %v98_v10  ;;  %v173_v50 = vsel %vm170_vm4, %v169_v45, %v105_v36 }
  0xa3   :  { %v172_v51 = vsel %vm170_vm4, %v168_v46, %v104_v37 }
  0xa4   :  { %v171_v53 = vsel %vm170_vm4, %v167_v49, %v103_v39 }
  0xa7   :  { %v118_v12 = vpop.xlane.xlu2 %117 }
  0xa8   :  { %v116_v11 = vpop.xlane.xlu1 %115  ;;  %v121_v40 = vsub.f32 0.0, %v118_v12 }
  0xa9   :  { %v114_v13 = vpop.xlane.xlu0 %113  ;;  %v120_v41 = vsub.f32 0.0, %v116_v11 }
  0xaa   :  { %v119_v43 = vsub.f32 0.0, %v114_v13  ;;  %v177_v54 = vsel %vm174_vm5, %v173_v50, %v121_v40 }
  0xab   :  { %v176_v55 = vsel %vm174_vm5, %v172_v51, %v120_v41 }
  0xac   :  { %v175_v59 = vsel %vm174_vm5, %v171_v53, %v119_v43 }
  0xaf   :  { %v134_v26 = vpop.xlane.xlu2 %133 }
  0xb0   :  { %v132_v21 = vpop.xlane.xlu1 %131  ;;  %v137_v47 = vsub.f32 0.0, %v134_v26 }
  0xb1   :  { %v130_v27 = vpop.xlane.xlu0 %129  ;;  %v136_v44 = vsub.f32 0.0, %v132_v21 }
  0xb2   :  { %v135_v48 = vsub.f32 0.0, %v130_v27  ;;  %v181_v63 = vsel %vm178_vm6, %v177_v54, %v137_v47 }
  0xb3   :  { %v180_v60 = vsel %vm178_vm6, %v176_v55, %v136_v44 }
  0xb4   :  { %v179_v0 = vsel %vm178_vm6, %v175_v59, %v135_v48 }
  0xb7   :  { %v150_v56 = vpop.xlane.xlu2 %149 }
  0xb8   :  { %v148_v52 = vpop.xlane.xlu1 %147  ;;  %v153_v61 = vsub.f32 0.0, %v150_v56 }
  0xb9   :  { %v152_v57 = vsub.f32 0.0, %v148_v52  ;;  %v146_v58 = vpop.xlane.xlu0 %145 }
  0xba   :  { %v151_v62 = vsub.f32 0.0, %v146_v58  ;;  %v185_v3 = vsel %vm182_vm7, %v181_v63, %v153_v61 }
  0xbb   :  { %v184_v1 = vsel %vm182_vm7, %v180_v60, %v152_v57  ;;  %189 = vst.msk [vmem:[%s391_s2 + $0x10] sm:$0xff] %vm186_vm8, %v185_v3 }
  0xbc   :  { %188 = vst.msk [vmem:[%s391_s2 + $0x8] sm:$0xff] %vm186_vm8, %v184_v1  ;;  %v183_v4 = vsel %vm182_vm7, %v179_v0, %v151_v62 }
  0xbd   :  { %187 = vst.msk [vmem:[%s391_s2] sm:$0xff] %vm186_vm8, %v183_v4 }

</bundles_post_ra>
